<compile_context>
chip_gen: v6e
topology: v6e:2x2x1
jax: 0.10.0
libtpu: 0.0.40
codegen_flags: <defaults>
</compile_context>

<pallas_src>
import functools

import jax
import jax.numpy as jnp
from jax.experimental import pallas as pl
from jax.experimental.pallas import tpu as pltpu


def _round_up(x, m):
    return ((x + m - 1) // m) * m


# -----------------------------------------------------------------------------
# Kernels
# -----------------------------------------------------------------------------
def _layernorm_epilogue(y, params_ref, o_ref, eps):
    """y: (tm, N) f32 with bias+residual already added.  params_ref: (3, N) f32."""
    n = y.shape[-1]
    gamma = params_ref[1:2, :]
    beta = params_ref[2:3, :]
    mean = jnp.sum(y, axis=-1, keepdims=True) * (1.0 / n)
    d = y - mean
    # Two-pass variance (y is resident in vregs) — safe against cancellation.
    var = jnp.sum(d * d, axis=-1, keepdims=True) * (1.0 / n)
    inv = jax.lax.rsqrt(var + eps)
    o_ref[...] = (d * inv * gamma + beta).astype(o_ref.dtype)


def _bert_output_kernel_single(x_ref, w_ref, params_ref, res_ref, o_ref, *, eps):
    # Single K step: no accumulator scratch / VMEM round-trip.
    # Native-dtype MXU matmul (bf16 fast path when inputs are bf16), f32 accumulate.
    y = jnp.dot(x_ref[...], w_ref[...], preferred_element_type=jnp.float32)
    y = y + params_ref[0:1, :] + res_ref[...].astype(jnp.float32)
    _layernorm_epilogue(y, params_ref, o_ref, eps)


def _bert_output_kernel_multi(x_ref, w_ref, params_ref, res_ref, o_ref, acc_ref, *, eps):
    k = pl.program_id(1)

    @pl.when(k == 0)
    def _():
        acc_ref[...] = jnp.zeros_like(acc_ref)

    acc_ref[...] += jnp.dot(x_ref[...], w_ref[...],
                            preferred_element_type=jnp.float32)

    @pl.when(k == pl.num_programs(1) - 1)
    def _():
        y = acc_ref[...] + params_ref[0:1, :] + res_ref[...].astype(jnp.float32)
        _layernorm_epilogue(y, params_ref, o_ref, eps)


# -----------------------------------------------------------------------------
# Wrapper
# -----------------------------------------------------------------------------
def _default_tm():
    # 256 fits v7x's 64 MiB VMEM and keeps >=2 parallel row tiles for M >= 512;
    # bump to 512 on chips with big VMEM (v5e/v6e: 128 MiB physical).
    try:
        info = pltpu.get_tpu_info()
        if getattr(info, "vmem_capacity_bytes", 0) >= (100 << 20):
            return 512
    except Exception:
        pass
    return 256


def bert_output(hidden_states, input_tensor, w, b, gamma, beta, *,
                eps=1e-12, tm=None, tk=None,
                single_buffer_params=True, vmem_limit_bytes=None):
    """Fused dense + dropout(identity, eval) + residual + LayerNorm.

    hidden_states: [B, S, K] intermediate activations
    input_tensor:  [B, S, N] residual
    w: [K, N]    b / gamma / beta: [N]
    tk: optional K tile (multiple of 128, divides K).  Default None = full K resident
        (recommended on v5e/v6e; partition K only when the weight block is too large,
        e.g. very large intermediate sizes on v7x).
    """
    B, S, K = hidden_states.shape
    N = input_tensor.shape[-1]
    M = B * S

    x2 = hidden_states.reshape(M, K)
    r2 = input_tensor.reshape(M, N)
    # bias / gamma / beta fused into one (3, N) f32 slab -> single constant block.
    params = jnp.stack([b.astype(jnp.float32),
                        gamma.astype(jnp.float32),
                        beta.astype(jnp.float32)], axis=0)

    if tm is None:
        tm = _default_tm()
    # No jnp.pad of the big activations: tm_eff is a multiple of 8; the ragged last row
    # tile is handled in-kernel (row-wise math only; OOB output rows are discarded).
    tm_eff = min(tm, _round_up(M, 8))
    n_row_tiles = pl.cdiv(M, tm_eff)

    multi_k = (tk is not None) and (tk < K)
    if multi_k:
        assert K % tk == 0 and tk % 128 == 0, "tk must divide K and be a multiple of 128"
    kblk = tk if multi_k else K

    x_it = jnp.dtype(x2.dtype).itemsize
    w_it = jnp.dtype(w.dtype).itemsize
    r_it = jnp.dtype(r2.dtype).itemsize
    out_dtype = hidden_states.dtype
    o_it = jnp.dtype(out_dtype).itemsize

    # --- explicit VMEM budget (working set + margin, clamped to fit v7x/v5e). ---
    est = (2 * tm_eff * kblk * x_it                    # x tile, double-buffered
           + (2 if multi_k else 1) * kblk * N * w_it   # weight (single-buffered when resident)
           + 2 * tm_eff * N * (r_it + o_it)            # residual + output tiles
           + 2 * 8 * N * 4                             # (3,N) f32 params (8-sublane padded)
           + (tm_eff * N * 4 if multi_k else 0))       # f32 accumulator scratch
    if vmem_limit_bytes is None:
        vmem_limit_bytes = min(64 << 20, max(32 << 20, int(est * 3 // 2)))

    # HBM traffic: in the K-tiled config the weight is re-streamed once per row tile.
    w_stream = (n_row_tiles if multi_k else 1) * K * N * w_it
    cost = pl.CostEstimate(
        flops=2 * M * K * N,
        transcendentals=M,  # one rsqrt per row
        bytes_accessed=int(x2.size * x_it + w_stream + r2.size * r_it
                           + params.size * 4 + M * N * o_it))

    def _run(use_single_buffer):
        def const_spec(shape, index_map):
            # Grid-invariant block: single-buffer it (no re-DMA => second buffer is waste).
            if use_single_buffer:
                return pl.BlockSpec(shape, index_map, pipeline_mode=pl.Buffered(1))
            return pl.BlockSpec(shape, index_map)

        if not multi_k:
            kernel = functools.partial(_bert_output_kernel_single, eps=eps)
            grid = (n_row_tiles,)
            in_specs = [
                pl.BlockSpec((tm_eff, K), lambda i: (i, 0)),   # x tile
                const_spec((K, N), lambda i: (0, 0)),          # weight, resident across rows
                const_spec((3, N), lambda i: (0, 0)),          # bias / gamma / beta
                pl.BlockSpec((tm_eff, N), lambda i: (i, 0)),   # residual tile
            ]
            out_specs = pl.BlockSpec((tm_eff, N), lambda i: (i, 0))
            scratch = []
            dims = ("parallel",)
        else:
            kernel = functools.partial(_bert_output_kernel_multi, eps=eps)
            grid = (n_row_tiles, K // tk)
            in_specs = [
                pl.BlockSpec((tm_eff, tk), lambda i, k: (i, k)),   # x tile
                pl.BlockSpec((tk, N), lambda i, k: (k, 0)),        # weight tile (varies in k)
                const_spec((3, N), lambda i, k: (0, 0)),           # bias / gamma / beta
                pl.BlockSpec((tm_eff, N), lambda i, k: (i, 0)),    # residual tile
            ]
            out_specs = pl.BlockSpec((tm_eff, N), lambda i, k: (i, 0))
            scratch = [pltpu.VMEM((tm_eff, N), jnp.float32)]
            dims = ("parallel", "arbitrary")

        return pl.pallas_call(
            kernel,
            out_shape=jax.ShapeDtypeStruct((M, N), out_dtype),
            grid_spec=pltpu.PrefetchScalarGridSpec(
                num_scalar_prefetch=0,
                grid=grid,
                in_specs=in_specs,
                out_specs=out_specs,
                scratch_shapes=scratch),
            compiler_params=pltpu.CompilerParams(
                dimension_semantics=dims,
                vmem_limit_bytes=vmem_limit_bytes),
            cost_estimate=cost,
        )(x2, w, params, r2)

    if single_buffer_params:
        try:
            out2 = _run(True)
        except Exception:
            # pl.Buffered(1) unsupported on this JAX version -> default double buffering.
            out2 = _run(False)
    else:
        out2 = _run(False)

    return out2.reshape(B, S, N)


# -----------------------------------------------------------------------------
# Pure-JAX reference + self-test
# -----------------------------------------------------------------------------
def reference(hidden_states, input_tensor, w, b, gamma, beta, eps=1e-12):
    h = jnp.einsum("bsk,kn->bsn", hidden_states.astype(jnp.float32),
                   w.astype(jnp.float32)) + b.astype(jnp.float32)
    y = h + input_tensor.astype(jnp.float32)
    mean = jnp.mean(y, axis=-1, keepdims=True)
    var = jnp.mean((y - mean) ** 2, axis=-1, keepdims=True)
    return ((y - mean) * jax.lax.rsqrt(var + eps)) * gamma.astype(jnp.float32) \
        + beta.astype(jnp.float32)


if __name__ == "__main__":
    key = jax.random.PRNGKey(0)
    eps = 1e-12

    def run_case(idx, B, S, K, N, dtype, tk=None, tm=None, atol=5e-4, rtol=5e-4):
        k1, k2, k3, k4 = jax.random.split(jax.random.fold_in(key, idx), 4)
        hs = jax.random.normal(k1, (B, S, K), jnp.float32).astype(dtype)
        it = jax.random.normal(k2, (B, S, N), jnp.float32).astype(dtype)
        w = (jax.random.normal(k3, (K, N), jnp.float32) * 0.05).astype(dtype)
        b = (jax.random.normal(k4, (N,), jnp.float32) * 0.05).astype(dtype)
        gamma = jnp.ones((N,), dtype)
        beta = jnp.zeros((N,), dtype)

        out = bert_output(hs, it, w, b, gamma, beta, eps=eps, tk=tk, tm=tm)
        out = jax.block_until_ready(out)

        ref = reference(hs, it, w, b, gamma, beta, eps=eps)
        assert out.shape == (B, S, N)
        err = float(jnp.max(jnp.abs(out.astype(jnp.float32) - ref)))
        assert jnp.allclose(out.astype(jnp.float32), ref, atol=atol, rtol=rtol), (
            f"case {idx}: B={B} S={S} K={K} N={N} dtype={dtype} tk={tk} max_err={err}")

    # 1) Small BertOutput-shaped case (intermediate->hidden), single-K fast path.
    run_case(0, 2, 8, 64, 32, jnp.float32)
    # 2) M = B*S not a multiple of the tile -> ragged (unpadded) row tail.
    run_case(1, 3, 10, 64, 32, jnp.float32)
    # 3) Multiple row tiles + ragged last tile (M=320, tm=128): weight stays resident.
    run_case(2, 2, 160, 64, 32, jnp.float32, tm=128)
    # 4) Multi-K-step accumulator path (tk < K).
    run_case(3, 2, 24, 256, 64, jnp.float32, tk=128)
    # 5) bf16 fast-MXU path (native-dtype operands, f32 epilogue, bf16 output).
    run_case(4, 2, 24, 256, 64, jnp.bfloat16, atol=3e-2, rtol=3e-2)

    print("KERNEL_OK")
</pallas_src>

<mosaic_0001>
module attributes {stable_mosaic.version = 11 : i64} {
  func.func @_bert_output_kernel_single(%arg0: i32, %arg1: memref<16x64xf32, #tpu.memory_space<vmem>>, %arg2: memref<64x32xf32, #tpu.memory_space<vmem>>, %arg3: memref<3x32xf32, #tpu.memory_space<vmem>>, %arg4: memref<16x32xf32, #tpu.memory_space<vmem>>, %arg5: memref<16x32xf32, #tpu.memory_space<vmem>>) attributes {dimension_semantics = [#tpu.dimension_semantics<parallel>], iteration_bounds = array<i64: 1>, scalar_prefetch = 0 : i64, scratch_operands = 0 : i64, tpu.core_type = #tpu.core_type<tc>, window_params = [{transform_indices = @transform_0, window_bounds = array<i64: 16, 64>}, {pipeline_mode = #tpu.pipeline_mode<synchronous>, transform_indices = @transform_1, window_bounds = array<i64: 64, 32>}, {pipeline_mode = #tpu.pipeline_mode<synchronous>, transform_indices = @transform_2, window_bounds = array<i64: 3, 32>}, {transform_indices = @transform_3, window_bounds = array<i64: 16, 32>}, {transform_indices = @transform_4, window_bounds = array<i64: 16, 32>}]} {
    %c0 = arith.constant 0 : index
    %c0_0 = arith.constant 0 : index
    %0 = vector.load %arg1[%c0, %c0_0] : memref<16x64xf32, #tpu.memory_space<vmem>>, vector<16x64xf32>
    %c0_1 = arith.constant 0 : index
    %c0_2 = arith.constant 0 : index
    %1 = vector.load %arg2[%c0_1, %c0_2] : memref<64x32xf32, #tpu.memory_space<vmem>>, vector<64x32xf32>
    %cst = arith.constant dense<0.000000e+00> : vector<16x32xf32>
    %2 = tpu.matmul %0, %1, %cst {dimension_numbers = #tpu.dot_dimension_numbers<[1], [0], [0], [1], [0, 0, 1, 1], [], []>} : vector<16x64xf32>, vector<64x32xf32>, vector<16x32xf32> -> vector<16x32xf32>
    %c0_3 = arith.constant 0 : index
    %c0_4 = arith.constant 0 : index
    %3 = vector.load %arg3[%c0_3, %c0_4] : memref<3x32xf32, #tpu.memory_space<vmem>>, vector<1x32xf32>
    %4 = vector.broadcast %3 : vector<1x32xf32> to vector<16x32xf32>
    %5 = arith.addf %2, %4 : vector<16x32xf32>
    %c0_5 = arith.constant 0 : index
    %c0_6 = arith.constant 0 : index
    %6 = vector.load %arg4[%c0_5, %c0_6] : memref<16x32xf32, #tpu.memory_space<vmem>>, vector<16x32xf32>
    %7 = arith.addf %5, %6 : vector<16x32xf32>
    %c1 = arith.constant 1 : index
    %c0_7 = arith.constant 0 : index
    %8 = vector.load %arg3[%c1, %c0_7] : memref<3x32xf32, #tpu.memory_space<vmem>>, vector<1x32xf32>
    %c2 = arith.constant 2 : index
    %c0_8 = arith.constant 0 : index
    %9 = vector.load %arg3[%c2, %c0_8] : memref<3x32xf32, #tpu.memory_space<vmem>>, vector<1x32xf32>
    %cst_9 = arith.constant dense<0.000000e+00> : vector<16xf32>
    %10 = vector.multi_reduction <add>, %7, %cst_9 [1] : vector<16x32xf32> to vector<16xf32>
    %11 = vector.shape_cast %10 : vector<16xf32> to vector<16x1xf32>
    %cst_10 = arith.constant 3.125000e-02 : f32
    %12 = vector.broadcast %cst_10 : f32 to vector<16x1xf32>
    %13 = arith.mulf %11, %12 : vector<16x1xf32>
    %14 = vector.broadcast %13 : vector<16x1xf32> to vector<16x32xf32>
    %15 = arith.subf %7, %14 : vector<16x32xf32>
    %16 = arith.mulf %15, %15 : vector<16x32xf32>
    %cst_11 = arith.constant dense<0.000000e+00> : vector<16xf32>
    %17 = vector.multi_reduction <add>, %16, %cst_11 [1] : vector<16x32xf32> to vector<16xf32>
    %18 = vector.shape_cast %17 : vector<16xf32> to vector<16x1xf32>
    %cst_12 = arith.constant 3.125000e-02 : f32
    %19 = vector.broadcast %cst_12 : f32 to vector<16x1xf32>
    %20 = arith.mulf %18, %19 : vector<16x1xf32>
    %cst_13 = arith.constant 9.99999996E-13 : f32
    %21 = vector.broadcast %cst_13 : f32 to vector<16x1xf32>
    %22 = arith.addf %20, %21 : vector<16x1xf32>
    %23 = math.rsqrt %22 : vector<16x1xf32>
    %24 = vector.broadcast %23 : vector<16x1xf32> to vector<16x32xf32>
    %25 = arith.mulf %15, %24 : vector<16x32xf32>
    %26 = vector.broadcast %8 : vector<1x32xf32> to vector<16x32xf32>
    %27 = arith.mulf %25, %26 : vector<16x32xf32>
    %28 = vector.broadcast %9 : vector<1x32xf32> to vector<16x32xf32>
    %29 = arith.addf %27, %28 : vector<16x32xf32>
    %c0_14 = arith.constant 0 : index
    %c0_15 = arith.constant 0 : index
    %30 = vector.load %arg5[%c0_14, %c0_15] : memref<16x32xf32, #tpu.memory_space<vmem>>, vector<16x32xf32>
    tpu.vector_store %arg5[%c0_14, %c0_15], %29 {strides = array<i32>} : memref<16x32xf32, #tpu.memory_space<vmem>>, vector<16x32xf32>,
    return
  }
  func.func @transform_0(%arg0: i32) -> (i32, i32) {
    %c0_i32 = arith.constant 0 : i32
    %c0_i32_0 = arith.constant 0 : i32
    return %arg0, %c0_i32 : i32, i32
  }
  func.func @transform_1(%arg0: i32) -> (i32, i32) {
    %c0_i32 = arith.constant 0 : i32
    %c0_i32_0 = arith.constant 0 : i32
    %c0_i32_1 = arith.constant 0 : i32
    return %c0_i32, %c0_i32_0 : i32, i32
  }
  func.func @transform_2(%arg0: i32) -> (i32, i32) {
    %c0_i32 = arith.constant 0 : i32
    %c0_i32_0 = arith.constant 0 : i32
    %c0_i32_1 = arith.constant 0 : i32
    return %c0_i32, %c0_i32_0 : i32, i32
  }
  func.func @transform_3(%arg0: i32) -> (i32, i32) {
    %c0_i32 = arith.constant 0 : i32
    %c0_i32_0 = arith.constant 0 : i32
    return %arg0, %c0_i32 : i32, i32
  }
  func.func @transform_4(%arg0: i32) -> (i32, i32) {
    %c0_i32 = arith.constant 0 : i32
    %c0_i32_0 = arith.constant 0 : i32
    return %arg0, %c0_i32 : i32, i32
  }
}

module attributes {stable_mosaic.version = 11 : i64} {
  func.func @_bert_output_kernel_single(%arg0: i32, %arg1: memref<16x64xf32, #tpu.memory_space<vmem>>, %arg2: memref<64x32xf32, #tpu.memory_space<vmem>>, %arg3: memref<3x32xf32, #tpu.memory_space<vmem>>, %arg4: memref<16x32xf32, #tpu.memory_space<vmem>>, %arg5: memref<16x32xf32, #tpu.memory_space<vmem>>) attributes {dimension_semantics = [#tpu.dimension_semantics<parallel>], iteration_bounds = array<i64: 1>, scalar_prefetch = 0 : i64, scratch_operands = 0 : i64, tpu.core_type = #tpu.core_type<tc>, window_params = [{transform_indices = @transform_0, window_bounds = array<i64: 16, 64>}, {pipeline_mode = #tpu.pipeline_mode<synchronous>, transform_indices = @transform_1, window_bounds = array<i64: 64, 32>}, {pipeline_mode = #tpu.pipeline_mode<synchronous>, transform_indices = @transform_2, window_bounds = array<i64: 3, 32>}, {transform_indices = @transform_3, window_bounds = array<i64: 16, 32>}, {transform_indices = @transform_4, window_bounds = array<i64: 16, 32>}]} {
    %c0 = arith.constant 0 : index
    %c0_0 = arith.constant 0 : index
    %0 = vector.load %arg1[%c0, %c0_0] : memref<16x64xf32, #tpu.memory_space<vmem>>, vector<16x64xf32>
    %c0_1 = arith.constant 0 : index
    %c0_2 = arith.constant 0 : index
    %1 = vector.load %arg2[%c0_1, %c0_2] : memref<64x32xf32, #tpu.memory_space<vmem>>, vector<64x32xf32>
    %cst = arith.constant dense<0.000000e+00> : vector<16x32xf32>
    %2 = tpu.matmul %0, %1, %cst {dimension_numbers = #tpu.dot_dimension_numbers<[1], [0], [0], [1], [0, 0, 1, 1], [], []>} : vector<16x64xf32>, vector<64x32xf32>, vector<16x32xf32> -> vector<16x32xf32>
    %c0_3 = arith.constant 0 : index
    %c0_4 = arith.constant 0 : index
    %3 = vector.load %arg3[%c0_3, %c0_4] : memref<3x32xf32, #tpu.memory_space<vmem>>, vector<1x32xf32>
    %4 = vector.broadcast %3 : vector<1x32xf32> to vector<16x32xf32>
    %5 = arith.addf %2, %4 : vector<16x32xf32>
    %c0_5 = arith.constant 0 : index
    %c0_6 = arith.constant 0 : index
    %6 = vector.load %arg4[%c0_5, %c0_6] : memref<16x32xf32, #tpu.memory_space<vmem>>, vector<16x32xf32>
    %7 = arith.addf %5, %6 : vector<16x32xf32>
    %c1 = arith.constant 1 : index
    %c0_7 = arith.constant 0 : index
    %8 = vector.load %arg3[%c1, %c0_7] : memref<3x32xf32, #tpu.memory_space<vmem>>, vector<1x32xf32>
    %c2 = arith.constant 2 : index
    %c0_8 = arith.constant 0 : index
    %9 = vector.load %arg3[%c2, %c0_8] : memref<3x32xf32, #tpu.memory_space<vmem>>, vector<1x32xf32>
    %cst_9 = arith.constant dense<0.000000e+00> : vector<16xf32>
    %10 = vector.multi_reduction <add>, %7, %cst_9 [1] : vector<16x32xf32> to vector<16xf32>
    %11 = vector.shape_cast %10 : vector<16xf32> to vector<16x1xf32>
    %cst_10 = arith.constant 3.125000e-02 : f32
    %12 = vector.broadcast %cst_10 : f32 to vector<16x1xf32>
    %13 = arith.mulf %11, %12 : vector<16x1xf32>
    %14 = vector.broadcast %13 : vector<16x1xf32> to vector<16x32xf32>
    %15 = arith.subf %7, %14 : vector<16x32xf32>
    %16 = arith.mulf %15, %15 : vector<16x32xf32>
    %cst_11 = arith.constant dense<0.000000e+00> : vector<16xf32>
    %17 = vector.multi_reduction <add>, %16, %cst_11 [1] : vector<16x32xf32> to vector<16xf32>
    %18 = vector.shape_cast %17 : vector<16xf32> to vector<16x1xf32>
    %cst_12 = arith.constant 3.125000e-02 : f32
    %19 = vector.broadcast %cst_12 : f32 to vector<16x1xf32>
    %20 = arith.mulf %18, %19 : vector<16x1xf32>
    %cst_13 = arith.constant 9.99999996E-13 : f32
    %21 = vector.broadcast %cst_13 : f32 to vector<16x1xf32>
    %22 = arith.addf %20, %21 : vector<16x1xf32>
    %23 = math.rsqrt %22 : vector<16x1xf32>
    %24 = vector.broadcast %23 : vector<16x1xf32> to vector<16x32xf32>
    %25 = arith.mulf %15, %24 : vector<16x32xf32>
    %26 = vector.broadcast %8 : vector<1x32xf32> to vector<16x32xf32>
    %27 = arith.mulf %25, %26 : vector<16x32xf32>
    %28 = vector.broadcast %9 : vector<1x32xf32> to vector<16x32xf32>
    %29 = arith.addf %27, %28 : vector<16x32xf32>
    %c0_14 = arith.constant 0 : index
    %c0_15 = arith.constant 0 : index
    %30 = vector.load %arg5[%c0_14, %c0_15] : memref<16x32xf32, #tpu.memory_space<vmem>>, vector<16x32xf32>
    tpu.vector_store %arg5[%c0_14, %c0_15], %29 {strides = array<i32>} : memref<16x32xf32, #tpu.memory_space<vmem>>, vector<16x32xf32>,
    return
  }
  func.func @transform_0(%arg0: i32) -> (i32, i32) {
    %c0_i32 = arith.constant 0 : i32
    %c0_i32_0 = arith.constant 0 : i32
    return %arg0, %c0_i32 : i32, i32
  }
  func.func @transform_1(%arg0: i32) -> (i32, i32) {
    %c0_i32 = arith.constant 0 : i32
    %c0_i32_0 = arith.constant 0 : i32
    %c0_i32_1 = arith.constant 0 : i32
    return %c0_i32, %c0_i32_0 : i32, i32
  }
  func.func @transform_2(%arg0: i32) -> (i32, i32) {
    %c0_i32 = arith.constant 0 : i32
    %c0_i32_0 = arith.constant 0 : i32
    %c0_i32_1 = arith.constant 0 : i32
    return %c0_i32, %c0_i32_0 : i32, i32
  }
  func.func @transform_3(%arg0: i32) -> (i32, i32) {
    %c0_i32 = arith.constant 0 : i32
    %c0_i32_0 = arith.constant 0 : i32
    return %arg0, %c0_i32 : i32, i32
  }
  func.func @transform_4(%arg0: i32) -> (i32, i32) {
    %c0_i32 = arith.constant 0 : i32
    %c0_i32_0 = arith.constant 0 : i32
    return %arg0, %c0_i32 : i32, i32
  }
}

</mosaic_0001>

<bundles_post_ra>
// kernel: tpu_custom_call.1
= control target key start
LH: loop header
LB: loop body
LE: loop exit
PB: predicated region body
PF: predicated region fallthrough
CT: control target
= control target key end

     0   :  { %vm33_vm0 = vcmask 523264   ;;  %s325_s0 = inlined_call_operand.vmem [shape: f32[16,64], index: 0, kind: input, shape index: {}]   ;;  %s326_s1 = inlined_call_operand.vmem [shape: f32[64,32], index: 1, kind: input, shape index: {}]   ;;  %s327_s2 = inlined_call_operand.vmem [shape: f32[3,32], index: 2, kind: input, shape index: {}]   ;;  %s328_s3 = inlined_call_operand.vmem [shape: f32[16,32], index: 3, kind: input, shape index: {}]   ;;  %s329_s4 = inlined_call_operand.hbm [shape: f32[16,32], index: 4, kind: output, shape index: {}]  }
   0x1   :  { %v27_v0 = vld [vmem:[%s326_s1 + $0x38] sm:$0xff]  ;;  %v26_v1 = vld [vmem:[%s326_s1 + $0x30] sm:$0xff]  ;;  %v25_v2 = vld [vmem:[%s326_s1 + $0x28] sm:$0xff] }
   0x2   :  { %193 = vmatprep.subr.mxu0 %v27_v0  ;;  %v18_v3 = vld [vmem:[%s325_s0] sm:$0xff] }
   0x3   :  { %194 = vmatpush3.msra.mxu0 %v27_v0  ;;  %209 = vmatprep.mubr.msk.f32.mxu0 %vm33_vm0, %v18_v3 }
   0x4   :  { %195 = vmatprep.subr.mxu0 %v26_v1 }
   0x5   :  { %9 = vsyncpa [#allocation3], 0  ;;  %196 = vmatpush3.msra.mxu0 %v26_v1  ;;  %v24_v4 = vld [vmem:[%s326_s1 + $0x20] sm:$0xff]  ;;  %v23_v5 = vld [vmem:[%s326_s1 + $0x18] sm:$0xff]  ;;  %vm121_vm1 = vcmask 261120   ;;  %s241_s16 = smov [#allocation2]  }
   0x6   :  { %197 = vmatprep.subr.mxu0 %v25_v2  ;;  %v22_v6 = vld [vmem:[%s326_s1 + $0x10] sm:$0xff]  ;;  %v21_v7 = vld [vmem:[%s326_s1 + $0x8] sm:$0xff]  ;;  %v20_v8 = vld [vmem:[%s326_s1] sm:$0xff]  ;;  %s167_s17 = sshll.u32 %s241_s16, 4  ;;  %s168_s17 = int_to_ptr.vmem [resolvable:$true] %s167_s17 }
   0x7   :  { %198 = vmatpush3.msra.mxu0 %v25_v2  ;;  %v19_v9 = vld [vmem:[%s325_s0 + $0x8] sm:$0xff]  ;;  %v178_v11 = vld [vmem:[%s327_s2] ss:$0 sm:$0xff]  ;;  %v181_v38 = vld [vmem:[%s327_s2 + $0x1] ss:$0 sm:$0xff]  ;;  %s219_s18 = scalar_lea.vmem %s168_s17, 256  ;;  %p224_p1 = scmp.lt.s32.totalorder %s168_s17, %s168_s17 }
   0x8   :  { %199 = vmatprep.subr.mxu0 %v24_v4  ;;  %v115_v13 = vld [vmem:[%s328_s3] sm:$0xff]  ;;  %v116_v16 = vld [vmem:[%s328_s3 + $0x8] sm:$0xff]  ;;  %p220_p0 = scmp.ne.s32.totalorder %s168_s17, %s219_s18  ;;  %p225_p2 = scmp.lt.s32.totalorder %s219_s18, %s219_s18 }
   0x9   :  { %200 = vmatpush3.msra.mxu0 %v24_v4  ;;  %v182_v40 = vld [vmem:[%s327_s2 + $0x2] ss:$0 sm:$0xff] }
   0xa   :  { %201 = vmatprep.subr.mxu0 %v23_v5  ;;  %p226_p3 = por %p225_p2, %p224_p1 }
   0xb   :  { %202 = vmatpush3.msra.mxu0 %v23_v5 }
   0xc   :  { %203 = vmatprep.subr.mxu0 %v22_v6  ;;  %p227_p4 = pnand %p226_p3, %p220_p0 }
   0xd   :  { %204 = vmatpush3.msra.mxu0 %v22_v6 }
   0xe   :  { %205 = vmatprep.subr.mxu0 %v21_v7 }
   0xf   :  { %206 = vmatpush3.msra.mxu0 %v21_v7 }
  0x10   :  { %207 = vmatprep.subr.mxu0 %v20_v8 }
  0x11   :  { %208 = vmatpush3.msra.mxu0 %v20_v8 }
  0x12   :  { %210 = vmatmul.mubr.msk.f32.vlgmr.msra.gmra.mxu0 %vm33_vm0, %v19_v9 }
  0xd2   :  { %v211_v10 = vpop.f32.mrf.mxu0 }
  0xd3   :  { %v112_v14 = vadd.f32 %v211_v10, %v178_v11 }
  0xd4   :  { %v106_v12 = vpop.f32.mrf.mxu0 }
  0xd5   :  { %v107_v15 = vadd.f32 %v178_v11, %v106_v12  ;;  %v118_v19 = vadd.f32 %v116_v16, %v112_v14 }
  0xd7   :  { %v117_v17 = vadd.f32 %v115_v13, %v107_v15  ;;  %v125_v20 = vsel %vm121_vm1, %v118_v19, 0.0 }
  0xd9   :  { %v122_v18 = vsel %vm121_vm1, %v117_v17, 0.0 }
  0xda   :  { %123 = vadd.xlane.f32.xlu0 %v122_v18 }
  0xde   :  { %126 = vadd.xlane.f32.xlu0 %v125_v20 }
 0x163   :  { %v124_v21 = vpop.xlane.xlu0 %123 }
 0x164   :  { %v128_v22 = vmul.f32 0.03125, %v124_v21 }
 0x166   :  { %v130_v23 = vsub.f32 %v117_v17, %v128_v22 }
 0x167   :  { %v127_v24 = vpop.xlane.xlu0 %126 }
 0x168   :  { %v129_v25 = vmul.f32 0.03125, %v127_v24  ;;  %v132_v26 = vmul.f32 %v130_v23, %v130_v23 }
 0x16a   :  { %v131_v27 = vsub.f32 %v118_v19, %v129_v25  ;;  %v134_v28 = vsel %vm121_vm1, %v132_v26, 0.0 }
 0x16b   :  { %135 = vadd.xlane.f32.xlu1 %v134_v28 }
 0x16c   :  { %v133_v29 = vmul.f32 %v131_v27, %v131_v27 }
 0x16e   :  { %v137_v30 = vsel %vm121_vm1, %v133_v29, 0.0 }
 0x16f   :  { %138 = vadd.xlane.f32.xlu1 %v137_v30 }
 0x1f4   :  { %v136_v31 = vpop.xlane.xlu1 %135 }
 0x1f5   :  { %v140_v32 = vmul.f32 0.03125, %v136_v31 }
 0x1f7   :  { %v142_v33 = vadd.f32 1e-12, %v140_v32 }
 0x1f8   :  { %v139_v34 = vpop.xlane.xlu1 %138 }
 0x1f9   :  { %215 = vrsqrt.f32 %v142_v33  ;;  %v141_v35 = vmul.f32 0.03125, %v139_v34 }
 0x1fb   :  { %v143_v36 = vadd.f32 1e-12, %v141_v35 }
 0x1fd   :  { %217 = vrsqrt.f32 %v143_v36 }
 0x206   :  { %v216_v37 = vpop.eup %215 }
 0x207   :  { %v146_v39 = vmul.f32 %v216_v37, %v130_v23 }
 0x209   :  { %v152_v41 = vmul.f32 %v181_v38, %v146_v39 }
 0x20a   :  { %v218_v42 = vpop.eup %217 }
 0x20b   :  { %v147_v43 = vmul.f32 %v218_v42, %v131_v27  ;;  %v158_v44 = vadd.f32 %v182_v40, %v152_v41 }
 0x20d   :  { %v153_v45 = vmul.f32 %v181_v38, %v147_v43  ;;  %160 = vst.msk [vmem:[#allocation2] sm:$0xff] %vm121_vm1, %v158_v44 }
 0x20f   :  { %v159_v46 = vadd.f32 %v182_v40, %v153_v45 }
 0x211   :  { %161 = vst.msk [vmem:[#allocation2 + $0x8] sm:$0xff] %vm121_vm1, %v159_v46 }
 0x212   :  { %230 = shalt.err (!%p227_p4)
}
 0x213   :  { %s242_s2 = smov 128   ;;  %s243_s19 = smov 8  }
 0x214   :  { %173 = dma.vmem_to_hbm [thread:$0]  %s168_s17, 256, %s329_s4, [#allocation3], %s242_s2, %s242_s2, %s243_s19  }
 0x215   :  { %239 = dma.done.wait [#allocation3], 256  }
 0x216   :  { %240 = vsyncadd [#allocation3], 4294967040 }
 0x217   :  { %177 = vsyncpa [#allocation3], 1 }

// kernel: tpu_custom_call.1
= control target key start
LH: loop header
LB: loop body
LE: loop exit
PB: predicated region body
PF: predicated region fallthrough
CT: control target
= control target key end

     0   :  { %vm33_vm0 = vcmask 523264   ;;  %s325_s0 = inlined_call_operand.vmem [shape: f32[16,64], index: 0, kind: input, shape index: {}]   ;;  %s326_s1 = inlined_call_operand.vmem [shape: f32[64,32], index: 1, kind: input, shape index: {}]   ;;  %s327_s2 = inlined_call_operand.vmem [shape: f32[3,32], index: 2, kind: input, shape index: {}]   ;;  %s328_s3 = inlined_call_operand.vmem [shape: f32[16,32], index: 3, kind: input, shape index: {}]   ;;  %s329_s4 = inlined_call_operand.hbm [shape: f32[16,32], index: 4, kind: output, shape index: {}]  }
   0x1   :  { %v27_v0 = vld [vmem:[%s326_s1 + $0x38] sm:$0xff]  ;;  %v26_v1 = vld [vmem:[%s326_s1 + $0x30] sm:$0xff]  ;;  %v25_v2 = vld [vmem:[%s326_s1 + $0x28] sm:$0xff] }
   0x2   :  { %193 = vmatprep.subr.mxu0 %v27_v0  ;;  %v18_v3 = vld [vmem:[%s325_s0] sm:$0xff] }
   0x3   :  { %194 = vmatpush3.msra.mxu0 %v27_v0  ;;  %209 = vmatprep.mubr.msk.f32.mxu0 %vm33_vm0, %v18_v3 }
   0x4   :  { %195 = vmatprep.subr.mxu0 %v26_v1 }
   0x5   :  { %9 = vsyncpa [#allocation3], 0  ;;  %196 = vmatpush3.msra.mxu0 %v26_v1  ;;  %v24_v4 = vld [vmem:[%s326_s1 + $0x20] sm:$0xff]  ;;  %v23_v5 = vld [vmem:[%s326_s1 + $0x18] sm:$0xff]  ;;  %vm121_vm1 = vcmask 261120   ;;  %s241_s16 = smov [#allocation2]  }
   0x6   :  { %197 = vmatprep.subr.mxu0 %v25_v2  ;;  %v22_v6 = vld [vmem:[%s326_s1 + $0x10] sm:$0xff]  ;;  %v21_v7 = vld [vmem:[%s326_s1 + $0x8] sm:$0xff]  ;;  %v20_v8 = vld [vmem:[%s326_s1] sm:$0xff]  ;;  %s167_s17 = sshll.u32 %s241_s16, 4  ;;  %s168_s17 = int_to_ptr.vmem [resolvable:$true] %s167_s17 }
   0x7   :  { %198 = vmatpush3.msra.mxu0 %v25_v2  ;;  %v19_v9 = vld [vmem:[%s325_s0 + $0x8] sm:$0xff]  ;;  %v178_v11 = vld [vmem:[%s327_s2] ss:$0 sm:$0xff]  ;;  %v181_v38 = vld [vmem:[%s327_s2 + $0x1] ss:$0 sm:$0xff]  ;;  %s219_s18 = scalar_lea.vmem %s168_s17, 256  ;;  %p224_p1 = scmp.lt.s32.totalorder %s168_s17, %s168_s17 }
   0x8   :  { %199 = vmatprep.subr.mxu0 %v24_v4  ;;  %v115_v13 = vld [vmem:[%s328_s3] sm:$0xff]  ;;  %v116_v16 = vld [vmem:[%s328_s3 + $0x8] sm:$0xff]  ;;  %p220_p0 = scmp.ne.s32.totalorder %s168_s17, %s219_s18  ;;  %p225_p2 = scmp.lt.s32.totalorder %s219_s18, %s219_s18 }
   0x9   :  { %200 = vmatpush3.msra.mxu0 %v24_v4  ;;  %v182_v40 = vld [vmem:[%s327_s2 + $0x2] ss:$0 sm:$0xff] }
   0xa   :  { %201 = vmatprep.subr.mxu0 %v23_v5  ;;  %p226_p3 = por %p225_p2, %p224_p1 }
   0xb   :  { %202 = vmatpush3.msra.mxu0 %v23_v5 }
   0xc   :  { %203 = vmatprep.subr.mxu0 %v22_v6  ;;  %p227_p4 = pnand %p226_p3, %p220_p0 }
   0xd   :  { %204 = vmatpush3.msra.mxu0 %v22_v6 }
   0xe   :  { %205 = vmatprep.subr.mxu0 %v21_v7 }
   0xf   :  { %206 = vmatpush3.msra.mxu0 %v21_v7 }
  0x10   :  { %207 = vmatprep.subr.mxu0 %v20_v8 }
  0x11   :  { %208 = vmatpush3.msra.mxu0 %v20_v8 }
  0x12   :  { %210 = vmatmul.mubr.msk.f32.vlgmr.msra.gmra.mxu0 %vm33_vm0, %v19_v9 }
  0xd2   :  { %v211_v10 = vpop.f32.mrf.mxu0 }
  0xd3   :  { %v112_v14 = vadd.f32 %v211_v10, %v178_v11 }
  0xd4   :  { %v106_v12 = vpop.f32.mrf.mxu0 }
  0xd5   :  { %v107_v15 = vadd.f32 %v178_v11, %v106_v12  ;;  %v118_v19 = vadd.f32 %v116_v16, %v112_v14 }
  0xd7   :  { %v117_v17 = vadd.f32 %v115_v13, %v107_v15  ;;  %v125_v20 = vsel %vm121_vm1, %v118_v19, 0.0 }
  0xd9   :  { %v122_v18 = vsel %vm121_vm1, %v117_v17, 0.0 }
  0xda   :  { %123 = vadd.xlane.f32.xlu0 %v122_v18 }
  0xde   :  { %126 = vadd.xlane.f32.xlu0 %v125_v20 }
 0x163   :  { %v124_v21 = vpop.xlane.xlu0 %123 }
 0x164   :  { %v128_v22 = vmul.f32 0.03125, %v124_v21 }
 0x166   :  { %v130_v23 = vsub.f32 %v117_v17, %v128_v22 }
 0x167   :  { %v127_v24 = vpop.xlane.xlu0 %126 }
 0x168   :  { %v129_v25 = vmul.f32 0.03125, %v127_v24  ;;  %v132_v26 = vmul.f32 %v130_v23, %v130_v23 }
 0x16a   :  { %v131_v27 = vsub.f32 %v118_v19, %v129_v25  ;;  %v134_v28 = vsel %vm121_vm1, %v132_v26, 0.0 }
 0x16b   :  { %135 = vadd.xlane.f32.xlu1 %v134_v28 }
 0x16c   :  { %v133_v29 = vmul.f32 %v131_v27, %v131_v27 }
 0x16e   :  { %v137_v30 = vsel %vm121_vm1, %v133_v29, 0.0 }
 0x16f   :  { %138 = vadd.xlane.f32.xlu1 %v137_v30 }
 0x1f4   :  { %v136_v31 = vpop.xlane.xlu1 %135 }
 0x1f5   :  { %v140_v32 = vmul.f32 0.03125, %v136_v31 }
 0x1f7   :  { %v142_v33 = vadd.f32 1e-12, %v140_v32 }
 0x1f8   :  { %v139_v34 = vpop.xlane.xlu1 %138 }
 0x1f9   :  { %215 = vrsqrt.f32 %v142_v33  ;;  %v141_v35 = vmul.f32 0.03125, %v139_v34 }
 0x1fb   :  { %v143_v36 = vadd.f32 1e-12, %v141_v35 }
 0x1fd   :  { %217 = vrsqrt.f32 %v143_v36 }
 0x206   :  { %v216_v37 = vpop.eup %215 }
 0x207   :  { %v146_v39 = vmul.f32 %v216_v37, %v130_v23 }
 0x209   :  { %v152_v41 = vmul.f32 %v181_v38, %v146_v39 }
 0x20a   :  { %v218_v42 = vpop.eup %217 }
 0x20b   :  { %v147_v43 = vmul.f32 %v218_v42, %v131_v27  ;;  %v158_v44 = vadd.f32 %v182_v40, %v152_v41 }
 0x20d   :  { %v153_v45 = vmul.f32 %v181_v38, %v147_v43  ;;  %160 = vst.msk [vmem:[#allocation2] sm:$0xff] %vm121_vm1, %v158_v44 }
 0x20f   :  { %v159_v46 = vadd.f32 %v182_v40, %v153_v45 }
 0x211   :  { %161 = vst.msk [vmem:[#allocation2 + $0x8] sm:$0xff] %vm121_vm1, %v159_v46 }
 0x212   :  { %230 = shalt.err (!%p227_p4)
}
 0x213   :  { %s242_s2 = smov 128   ;;  %s243_s19 = smov 8  }
 0x214   :  { %173 = dma.vmem_to_hbm [thread:$0]  %s168_s17, 256, %s329_s4, [#allocation3], %s242_s2, %s242_s2, %s243_s19  }
 0x215   :  { %239 = dma.done.wait [#allocation3], 256  }
 0x216   :  { %240 = vsyncadd [#allocation3], 4294967040 }
 0x217   :  { %177 = vsyncpa [#allocation3], 1 }

</bundles_post_ra>
